<compile_context>
chip_gen: v7x
topology: tpu7x:2x2x1
jax: 0.10.0
libtpu: 0.0.40
codegen_flags: <defaults>
</compile_context>

<pallas_src>
import jax
import jax.numpy as jnp
from jax import lax
from jax.experimental import pallas as pl
from jax.experimental.pallas import tpu as pltpu

_LANE = 128
_P = 2                # parallel slices: maps onto the 2 TensorCores on v7x
_MAX_ROW_TILE = 4096  # 4096 x 128 x 4B = 2 MiB per f32 input block (1 MiB bf16)


def _round_up(v, m):
    return (v + m - 1) // m * m


def _make_mse_partial_kernel(row_tile, rows_per_p, needs_mask):
    """Kernel: accumulate sum((x-y)^2) of one p-slice into an (8,128) block."""

    def kernel(x_ref, y_ref, o_ref):
        # o_ref: (8, 128) f32, resident across the k (reduction) grid axis.
        @pl.when(pl.program_id(1) == 0)
        def _init():
            o_ref[...] = jnp.zeros_like(o_ref)

        # Native-dtype HBM stream, f32 math in-register.
        d = x_ref[...].astype(jnp.float32) - y_ref[...].astype(jnp.float32)
        sq = d * d  # (row_tile, 128)

        if needs_mask:
            # Trailing partial block: rows beyond the array extent hold
            # undefined data -> zero them (cheap VALU compare+select).
            k = pl.program_id(1)
            valid = rows_per_p - k * row_tile
            row_ids = lax.broadcasted_iota(jnp.int32, (row_tile, _LANE), 0)
            sq = jnp.where(row_ids < valid, sq, 0.0)

        # Fold rows down to an (8, 128) partial sum with pure VALU adds
        # (no per-step cross-lane XLU reduce, no (1,1) scalar RMW).
        part = jnp.zeros((8, _LANE), jnp.float32)
        r8 = (row_tile // 8) * 8
        if r8 > 0:
            part = part + sq[:r8].reshape(r8 // 8, 8, _LANE).sum(axis=0)
        rem = row_tile - r8
        if rem > 0:  # only for tiny inputs where row_tile is not a multiple of 8
            tail = sq[r8:].sum(axis=0, keepdims=True)            # (1, 128)
            row_ids8 = lax.broadcasted_iota(jnp.int32, (8, _LANE), 0)
            part = part + jnp.where(
                row_ids8 == 0, jnp.broadcast_to(tail, (8, _LANE)), 0.0)

        o_ref[...] = o_ref[...] + part

    return kernel


def _mse_loss_pallas(pred, target):
    """mean((pred - target)**2) via a lane-dense streaming Pallas reduction."""
    assert pred.shape == target.shape, (pred.shape, target.shape)
    n = pred.size
    assert n > 0, "MSE of an empty tensor is undefined"

    xf = jnp.ravel(pred)
    yf = jnp.ravel(target)

    chunk = _P * _LANE
    padded = _round_up(n, chunk)
    if padded != n:
        # Minimal pad (< P*128 zeros), only when numel is ragged; zero padding
        # contributes 0 to the squared-error sum and the mean divides by n.
        xf = jnp.pad(xf, (0, padded - n))
        yf = jnp.pad(yf, (0, padded - n))

    rows_per_p = padded // chunk
    x3 = xf.reshape(_P, rows_per_p, _LANE)
    y3 = yf.reshape(_P, rows_per_p, _LANE)

    row_tile = min(rows_per_p, _MAX_ROW_TILE)
    num_k = pl.cdiv(rows_per_p, row_tile)
    needs_mask = (rows_per_p % row_tile) != 0

    kernel = _make_mse_partial_kernel(row_tile, rows_per_p, needs_mask)

    bytes_in = (x3.dtype.itemsize + y3.dtype.itemsize) * padded
    partials = pl.pallas_call(
        kernel,
        out_shape=jax.ShapeDtypeStruct((_P, 8, _LANE), jnp.float32),
        grid=(_P, num_k),
        in_specs=[
            pl.BlockSpec((None, row_tile, _LANE), lambda p, k: (p, k, 0)),
            pl.BlockSpec((None, row_tile, _LANE), lambda p, k: (p, k, 0)),
        ],
        out_specs=pl.BlockSpec((None, 8, _LANE), lambda p, k: (p, 0, 0)),
        compiler_params=pltpu.CompilerParams(
            dimension_semantics=("parallel", "arbitrary"),
            vmem_limit_bytes=32 * 1024 * 1024,
        ),
        cost_estimate=pl.CostEstimate(
            flops=3 * n,
            transcendentals=0,
            bytes_accessed=bytes_in + _P * 8 * _LANE * 4,
        ),
    )(x3, y3)

    # Single tiny cross-lane reduce + mean, outside the kernel.
    return (jnp.sum(partials) / jnp.float32(n)).astype(pred.dtype)


def regularized_loss_forward(pred, target, trainer=None, model=None):
    """JAX/Pallas equivalent of RegularizedLoss('MSELoss').forward(pred, target).

    With trainer=None and model=None the PyTorch module warns and returns
    total_loss == main_loss == MSELoss()(pred, target).
    """
    main_loss = _mse_loss_pallas(pred, target)
    # TODO(synk): collect_losses(model) walks a torch nn.Module tree for
    # `_losses` dicts; with trainer=None and model=None (the exercised path)
    # the regularization term is skipped and total_loss == main_loss.
    return main_loss


if __name__ == "__main__":
    key = jax.random.PRNGKey(0)
    k1, k2 = jax.random.split(key)
    pred = jax.random.normal(k1, (2, 4, 16, 16), dtype=jnp.float32)
    target = jax.random.normal(k2, (2, 4, 16, 16), dtype=jnp.float32)

    out = regularized_loss_forward(pred, target)
    out = jax.block_until_ready(out)

    ref = jnp.mean((pred - target) ** 2)
    assert out.shape == (), out.shape
    assert out.dtype == pred.dtype, (out.dtype, pred.dtype)
    assert jnp.allclose(out, ref, rtol=1e-6, atol=1e-6), (out, ref)

    print("KERNEL_OK")
</pallas_src>

<mosaic_0001>
module attributes {stable_mosaic.version = 11 : i64} {
  func.func @kernel(%arg0: i32, %arg1: i32, %arg2: memref<1x8x128xf32, #tpu.memory_space<vmem>>, %arg3: memref<1x8x128xf32, #tpu.memory_space<vmem>>, %arg4: memref<1x8x128xf32, #tpu.memory_space<vmem>>) attributes {dimension_semantics = [#tpu.dimension_semantics<parallel>, #tpu.dimension_semantics<arbitrary>], iteration_bounds = array<i64: 2, 1>, scalar_prefetch = 0 : i64, scratch_operands = 0 : i64, tpu.core_type = #tpu.core_type<tc>, window_params = [{transform_indices = @transform_0, window_bounds = array<i64: 1, 8, 128>}, {transform_indices = @transform_1, window_bounds = array<i64: 1, 8, 128>}, {transform_indices = @transform_2, window_bounds = array<i64: 1, 8, 128>}]} {
    %c0_i32 = arith.constant 0 : i32
    %0 = arith.cmpi eq, %arg1, %c0_i32 : i32
    %1 = arith.extui %0 : i1 to i32
    %c0_i32_0 = arith.constant 0 : i32
    %2 = arith.cmpi ne, %1, %c0_i32_0 : i32
    scf.if %2 {
      %cst_13 = arith.constant 0.000000e+00 : f32
      %19 = vector.broadcast %cst_13 : f32 to vector<8x128xf32>
      %c0_14 = arith.constant 0 : index
      %c0_15 = arith.constant 0 : index
      %c0_16 = arith.constant 0 : index
      %20 = vector.load %arg4[%c0_14, %c0_15, %c0_16] : memref<1x8x128xf32, #tpu.memory_space<vmem>>, vector<1x8x128xf32>
      %21 = vector.shape_cast %20 : vector<1x8x128xf32> to vector<8x128xf32>
      %22 = vector.shape_cast %19 : vector<8x128xf32> to vector<1x8x128xf32>
      tpu.vector_store %arg4[%c0_14, %c0_15, %c0_16], %22 {strides = array<i32>} : memref<1x8x128xf32, #tpu.memory_space<vmem>>, vector<1x8x128xf32>,
    } else {
    }
    %c0 = arith.constant 0 : index
    %c0_1 = arith.constant 0 : index
    %c0_2 = arith.constant 0 : index
    %3 = vector.load %arg2[%c0, %c0_1, %c0_2] : memref<1x8x128xf32, #tpu.memory_space<vmem>>, vector<1x8x128xf32>
    %4 = vector.shape_cast %3 : vector<1x8x128xf32> to vector<8x128xf32>
    %c0_3 = arith.constant 0 : index
    %c0_4 = arith.constant 0 : index
    %c0_5 = arith.constant 0 : index
    %5 = vector.load %arg3[%c0_3, %c0_4, %c0_5] : memref<1x8x128xf32, #tpu.memory_space<vmem>>, vector<1x8x128xf32>
    %6 = vector.shape_cast %5 : vector<1x8x128xf32> to vector<8x128xf32>
    %7 = arith.subf %4, %6 : vector<8x128xf32>
    %8 = arith.mulf %7, %7 : vector<8x128xf32>
    %cst = arith.constant 0.000000e+00 : f32
    %9 = vector.broadcast %cst : f32 to vector<8x128xf32>
    %10 = vector.shape_cast %8 : vector<8x128xf32> to vector<1x8x128xf32>
    %cst_6 = arith.constant dense<0.000000e+00> : vector<8x128xf32>
    %11 = vector.multi_reduction <add>, %10, %cst_6 [0] : vector<1x8x128xf32> to vector<8x128xf32>
    %12 = arith.addf %9, %11 : vector<8x128xf32>
    %c0_7 = arith.constant 0 : index
    %c0_8 = arith.constant 0 : index
    %c0_9 = arith.constant 0 : index
    %13 = vector.load %arg4[%c0_7, %c0_8, %c0_9] : memref<1x8x128xf32, #tpu.memory_space<vmem>>, vector<1x8x128xf32>
    %14 = vector.shape_cast %13 : vector<1x8x128xf32> to vector<8x128xf32>
    %15 = arith.addf %14, %12 : vector<8x128xf32>
    %c0_10 = arith.constant 0 : index
    %c0_11 = arith.constant 0 : index
    %c0_12 = arith.constant 0 : index
    %16 = vector.load %arg4[%c0_10, %c0_11, %c0_12] : memref<1x8x128xf32, #tpu.memory_space<vmem>>, vector<1x8x128xf32>
    %17 = vector.shape_cast %16 : vector<1x8x128xf32> to vector<8x128xf32>
    %18 = vector.shape_cast %15 : vector<8x128xf32> to vector<1x8x128xf32>
    tpu.vector_store %arg4[%c0_10, %c0_11, %c0_12], %18 {strides = array<i32>} : memref<1x8x128xf32, #tpu.memory_space<vmem>>, vector<1x8x128xf32>,
    return
  }
  func.func @transform_0(%arg0: i32, %arg1: i32) -> (i32, i32, i32) {
    %c0_i32 = arith.constant 0 : i32
    %c0_i32_0 = arith.constant 0 : i32
    return %arg0, %arg1, %c0_i32 : i32, i32, i32
  }
  func.func @transform_1(%arg0: i32, %arg1: i32) -> (i32, i32, i32) {
    %c0_i32 = arith.constant 0 : i32
    %c0_i32_0 = arith.constant 0 : i32
    return %arg0, %arg1, %c0_i32 : i32, i32, i32
  }
  func.func @transform_2(%arg0: i32, %arg1: i32) -> (i32, i32, i32) {
    %c0_i32 = arith.constant 0 : i32
    %c0_i32_0 = arith.constant 0 : i32
    %c0_i32_1 = arith.constant 0 : i32
    return %arg0, %c0_i32, %c0_i32_0 : i32, i32, i32
  }
}

</mosaic_0001>

<bundles_post_ra>
// kernel: tpu_custom_call.1
= control target key start
LH: loop header
LB: loop body
LE: loop exit
PB: predicated region body
PF: predicated region fallthrough
CT: control target
= control target key end

     0   :  { %7 = vsyncpa [#allocation3], 0  ;;  %s815_s0 = inlined_call_operand.hbm [shape: f32[2,8,128], index: 0, kind: input, shape index: {}]   ;;  %s816_s1 = inlined_call_operand.hbm [shape: f32[2,8,128], index: 1, kind: input, shape index: {}]   ;;  %s817_s2 = inlined_call_operand.hbm [shape: f32[2,8,128], index: 2, kind: output, shape index: {}]  }
   0x1   :  { %9 = vsyncpa [#allocation3 + $0x1], 0 }
   0x2   :  { %10 = vsyncpa [#allocation6], 0 }
   0x3   :  { %12 = vsyncpa [#allocation6 + $0x1], 0 }
   0x4   :  { %13 = vsyncpa [#allocation4], 0 }
   0x5   :  { %15 = vsyncpa [#allocation4 + $0x1], 0  ;;  %s595_s9 = smov 0   ;;  %s597_s10 = smov 0  }
   0x6   :  { %s599_s11 = smov 0   ;;  %s601_s12 = smov 0  }
   0x7   :  { %s603_s13 = smov 0   ;;  %s605_s14 = smov 0  }
   0x8 LB: > { %s345_s15 = sadd.s32 4294967295, %s575_s14   ;;  %s346_s16 = sadd.s32 4294967294, %s575_s14   ;;  %s575_s14 = sphi %s605_s14, %s21_s14   ;;  %s571_s13 = sphi %s603_s13, %s837_s13   ;;  %s567_s12 = sphi %s601_s12, %s836_s12   ;;  %s563_s11 = sphi %s599_s11, %s835_s11   ;;  %s559_s10 = sphi %s597_s10, %s834_s10   ;;  %s555_s9 = sphi %s595_s9, %s833_s9  }
   0x9   : > { %s33_s17 = sadd.s32 1, %s571_s13  ;;  %s42_s18 = sadd.s32 1, %s563_s11 }
   0xa   : > { %p35_p0 = scmp.ge.s32.totalorder %s33_s17, 2  ;;  %p49_p1 = scmp.ne.s32.totalorder %s563_s11, %s559_s10 }
   0xb   : > { %p50_p2 = scmp.eq.s32.totalorder %s575_s14, 0  ;;  %p55_p3 = scmp.ne.s32.totalorder %s559_s10, %s555_s9 }
   0xc   : > { %s839_s17 = smov (%p35_p0, %s33_s17), 0  ;;  %p56_p5 = scmp.eq.s32.totalorder %s345_s15, 0 }
   0xd   : > { %p636_p4 = por %p50_p2, %p49_p1  ;;  %s37_s20 = ssub.s32 %s571_s13, %s839_s17 }
   0xe   : > { %p107_p6 = scmp.eq.s32.totalorder %s345_s15, 1  ;;  %p40_p7 = scmp.eq.s32.totalorder %s37_s20, 0 }
   0xf   : > { %p642_p8 = por %p56_p5, %p55_p3  ;;  %p113_p10 = scmp.eq.s32.totalorder %s346_s16, 1 }
  0x10   : > { %p646_p9 = por %p107_p6, %p49_p1  ;;  %p378_p13 = scmp.lt.s32.totalorder %s575_s14, 2 }
  0x11   : > { %s821_s21 = scalar_select %p642_p8, 1, 0 }
  0x12   : > { %s822_s22 = scalar_select %p646_p9, 1, 0 }
  0x13   : > { %s651_s23 = scalar_select %p40_p7, %s563_s11, %s42_s18  }
  0x14   : > { %p653_p11 = por %p113_p10, %p55_p3  ;;  %s660_s25 = sand.u32 1, %s563_s11  }
  0x15   : > { %s349_s26 = sshll.u32 %s660_s25, 3  ;;  %s350_s27 = sshll.u32 %s571_s13, 7 }
  0x16   : > { %s823_s24 = scalar_select %p653_p11, 1, 0 }
  0x17   : > { %s669_s30 = scalar_lea.hbm %s815_s0, %s350_s27  ;;  %s137_s3 = scalar_lea.vmem [#allocation2], %s349_s26 }
  0x18   : > { %s145_s4 = sshll.u32 %s137_s3, 4  ;;  %p677_p0 = pnand %p378_p13, %p636_p4  ;;  %s673_s4 = int_to_ptr.vmem [resolvable:$true] %s145_s4 }
  0x19   : > { %s134_s6 = scalar_lea.sflag [#allocation3], %s660_s25  ;;  %s429_s7 = scalar_lea.hbm %s669_s30, 128 }
  0x1a   : > { %p430_p3 = scmp.ne.s32.totalorder %s669_s30, %s429_s7  ;;  %p431_p5 = pneg %p677_p0 }
  0x1b   : > { %s434_s16 = scalar_lea.hbm %s815_s0, 256  ;;  %p435_p4 = scmp.lt.u32.totalorder %s669_s30, %s815_s0 }
  0x1c   : > { %p432_p6 = pnand %p431_p5, %p430_p3  ;;  %p436_p10 = scmp.lt.u32.totalorder %s434_s16, %s429_s7 }
  0x1d   : > { %p438_p12 = scmp.lt.u32.totalorder %s429_s7, %s669_s30 }
  0x1e   : > { %p433_p7 = pneg %p432_p6  ;;  %p437_p13 = por %p436_p10, %p435_p4 }
  0x20   : > { %p439_p1 = por %p438_p12, %p437_p13 }
  0x22   : > { %p440_p2 = pnand %p439_p1, %p433_p7 }
  0x24   : > { %443 = shalt.err (!%p440_p2)
}
  0x25   : > { %s444_s20 = scalar_lea.vmem %s673_s4, 128  ;;  %s577_s28 = smov [#allocation2]  }
  0x26   : > { %p445_p3 = scmp.ne.s32.totalorder %s673_s4, %s444_s20  ;;  %s449_s29 = sshll.u32 %s577_s28, 4  ;;  %s450_s29 = int_to_ptr.vmem [resolvable:$false] %s449_s29 }
  0x27   : > { %s451_s3 = scalar_lea.vmem %s450_s29, 256  ;;  %p452_p9 = scmp.lt.s32.totalorder %s673_s4, %s450_s29 }
  0x28   : > { %p447_p6 = pnand %p445_p3, %p431_p5  ;;  %p453_p4 = scmp.lt.s32.totalorder %s451_s3, %s444_s20 }
  0x2a   : > { %p448_p11 = pneg %p447_p6  ;;  %p454_p10 = por %p453_p4, %p452_p9 }
  0x2c   : > { %p455_p12 = pnand %p454_p10, %p448_p11 }
  0x2e   : > { %458 = shalt.err (!%p455_p12)
}
  0x2f   : > { %370 = dma.hbm_to_vmem [thread:$0]  (!%p677_p0), %s669_s30, 128, %s673_s4, %s134_s6  }
  0x30   : > { %p825_p1 = scmp.lt.s32.totalorder %s575_s14, 3  ;;  %p826_p2 = scmp.ge.s32.totalorder %s575_s14, 1 }
  0x31   : > { %s722_s16 = scalar_lea.hbm %s816_s1, %s350_s27  ;;  %s156_s18 = scalar_lea.vmem [#allocation5], %s349_s26 }
  0x32   : > { %p713_p7 = pnand %p826_p2, %p825_p1  ;;  %s164_s19 = sshll.u32 %s156_s18, 4  ;;  %s165_s19 = int_to_ptr.vmem [resolvable:$true] %s164_s19 }
  0x33   : > { %s153_s30 = scalar_lea.sflag [#allocation6], %s660_s25  ;;  %s459_s4 = scalar_lea.hbm %s722_s16, 128 }
  0x34   : > { %s827_s7 = scalar_select %p713_p7, 1, 0 }
  0x35   : > { %p460_p9 = scmp.ne.s32.totalorder %s722_s16, %s459_s4  ;;  %s464_s27 = scalar_lea.hbm %s816_s1, 256 }
  0x36   : > { %p465_p3 = scmp.lt.u32.totalorder %s722_s16, %s816_s1  ;;  %p466_p6 = scmp.lt.u32.totalorder %s464_s27, %s459_s4 }
  0x37   : > { %p462_p11 = pnand %p460_p9, %p431_p5  ;;  %p468_p10 = scmp.lt.u32.totalorder %s459_s4, %s722_s16 }
  0x38   : > { %p467_p4 = por %p466_p6, %p465_p3 }
  0x39   : > { %p463_p13 = pneg %p462_p11 }
  0x3a   : > { %p469_p12 = por %p468_p10, %p467_p4 }
  0x3c   : > { %p470_p1 = pnand %p469_p12, %p463_p13 }
  0x3e   : > { %473 = shalt.err (!%p470_p1)
}
  0x3f   : > { %s474_s25 = scalar_lea.vmem %s165_s19, 128  ;;  %s578_s26 = smov [#allocation5]  }
  0x40   : > { %p475_p2 = scmp.ne.s32.totalorder %s165_s19, %s474_s25  ;;  %s479_s3 = sshll.u32 %s578_s26, 4  ;;  %s480_s3 = int_to_ptr.vmem [resolvable:$false] %s479_s3 }
  0x41   : > { %s481_s8 = scalar_lea.vmem %s480_s3, 256  ;;  %p482_p8 = scmp.lt.s32.totalorder %s165_s19, %s480_s3 }
  0x42   : > { %p477_p9 = pnand %p475_p2, %p431_p5  ;;  %p483_p7 = scmp.lt.s32.totalorder %s481_s8, %s474_s25 }
  0x44   : > { %p478_p11 = pneg %p477_p9  ;;  %p484_p3 = por %p483_p7, %p482_p8 }
  0x46   : > { %p485_p6 = pnand %p484_p3, %p478_p11 }
  0x48   : > { %488 = shalt.err (!%p485_p6)
}
  0x49   : > { %373 = dma.hbm_to_vmem [thread:$0]  (!%p677_p0), %s722_s16, 128, %s165_s19, %s153_s30  }
  0x4a   : > { %p828_p13 = scmp.ne.s32.totalorder %s827_s7, 0 }
  0x4b   : > { %s749_s15 = sand.u32 (!%p828_p13), 1, %s559_s10   ;;  %p829_p5 = scmp.ne.s32.totalorder (!%p828_p13), %s821_s21, 0 }
  0x4c   : > { %173 = sbr.rel (%p828_p13) target bundleno = 112 (0x70), region = 28  ;;  %s354_s18 = sshll.u32 (!%p828_p13), %s749_s15, 3 }
  0x4d   : > { %s176_s4 = scalar_lea.sflag (!%p828_p13), [#allocation3], %s749_s15  ;;  %s179_s6 = scalar_lea.vmem (!%p828_p13), [#allocation2], %s354_s18 }
  0x53   : > { %542 = dma.done.wait (%p829_p5), %s176_s4, 128  }
  0x54   : > { %544 = vsyncadd (%p829_p5), %s176_s4, 4294967168  ;;  %s185_s5 = scalar_lea.sflag [#allocation6], %s749_s15  ;;  %s188_s16 = scalar_lea.vmem [#allocation5], %s354_s18 }
  0x55   : > { %546 = dma.done.wait (%p829_p5), %s185_s5, 128  }
  0x56   : > { %548 = vsyncadd (%p829_p5), %s185_s5, 4294967168  ;;  %v219_v0 = vld [vmem:[%s179_s6] sm:$0xff]  ;;  %v220_v1 = vld [vmem:[%s188_s16] sm:$0xff]  ;;  %s358_s7 = sshll.u32 %s567_s12, 7  ;;  %s213_s19 = scalar_lea.vmem [#allocation7], %s354_s18 }
  0x57   : > { %v221_v2 = vsub.f32 %v219_v0, %v220_v1  ;;  %s242_s30 = sshll.u32 %s213_s19, 4  ;;  %s766_s28 = scalar_lea.hbm %s817_s2, %s358_s7  ;;  %s768_s30 = int_to_ptr.vmem [resolvable:$true] %s242_s30 }
  0x58   : > { %s229_s21 = scalar_lea.sflag [#allocation4], %s749_s15  ;;  %s489_s29 = scalar_lea.vmem %s768_s30, 128 }
  0x59   : > { %v222_v3 = vmul.f32 %v221_v2, %v221_v2  ;;  %p490_p8 = scmp.ne.s32.totalorder %s768_s30, %s489_s29  ;;  %p830_p0 = scmp.ne.s32.totalorder %s822_s22, 0 }
  0x5a   : > { %s579_s12 = smov [#allocation7]  }
  0x5b   : > { %227 = vst [vmem:[%s213_s19] sm:$0xff] %v222_v3  ;;  %p491_p7 = pnand %p490_p8, %p830_p0  ;;  %s493_s25 = sshll.u32 %s579_s12, 4  ;;  %s494_s25 = int_to_ptr.vmem [resolvable:$false] %s493_s25 }
  0x5c   : > { %s495_s26 = scalar_lea.vmem %s494_s25, 256  ;;  %p496_p10 = scmp.lt.s32.totalorder %s768_s30, %s494_s25 }
  0x5d   : > { %p492_p4 = pneg %p491_p7  ;;  %p497_p12 = scmp.lt.s32.totalorder %s495_s26, %s489_s29 }
  0x5f   : > { %p498_p1 = por %p497_p12, %p496_p10 }
  0x61   : > { %p499_p2 = pnand %p498_p1, %p492_p4 }
  0x63   : > { %502 = shalt.err (!%p499_p2)
}
  0x64   : > { %s503_s3 = scalar_lea.hbm %s766_s28, 128  ;;  %s507_s18 = scalar_lea.hbm %s817_s2, 256 }
  0x65   : > { %p504_p9 = scmp.ne.s32.totalorder %s766_s28, %s503_s3  ;;  %p508_p6 = scmp.lt.u32.totalorder %s766_s28, %s817_s2 }
  0x66   : > { %p509_p13 = scmp.lt.u32.totalorder %s507_s18, %s503_s3  ;;  %p511_p8 = scmp.lt.u32.totalorder %s503_s3, %s766_s28 }
  0x67   : > { %p505_p11 = pnand %p504_p9, %p830_p0 }
  0x68   : > { %p510_p5 = por %p509_p13, %p508_p6 }
  0x69   : > { %p506_p3 = pneg %p505_p11 }
  0x6a   : > { %p512_p7 = por %p511_p8, %p510_p5 }
  0x6c   : > { %p513_p4 = pnand %p512_p7, %p506_p3 }
  0x6e   : > { %516 = shalt.err (!%p513_p4)
}
  0x6f   : > { %365 = dma.vmem_to_hbm [thread:$0]  (%p830_p0), %s768_s30, 128, %s766_s28, %s229_s21  }
  0x70 PF: > { %s254_s5 = sand.u32 1, %s555_s9   ;;  %p831_p10 = scmp.ne.s32.totalorder %s823_s24, 0 }
  0x71   : > { %p832_p12 = scmp.ge.s32.totalorder %s575_s14, 2  ;;  %s255_s16 = scalar_lea.sflag [#allocation4], %s254_s5 }
  0x73   : > { %p375_p1 = pnand %p832_p12, %p831_p10 }
  0x75   : > { %550 = dma.done.wait (!%p375_p1), %s255_s16, 128  }
  0x76   : > { %552 = vsyncadd (!%p375_p1), %s255_s16, 4294967168  ;;  %s21_s14 = sadd.s32 1, %s575_s14   ;;  %s833_s9 = smov %s559_s10 }
  0x77   : > { %p18_p2 = scmp.ge.s32.totalorder %s21_s14, 4   ;;  %s834_s10 = smov %s563_s11 }
  0x78   : > { %s835_s11 = smov %s651_s23  ;;  %s836_s12 = smov %s571_s13 }
  0x79   : > { %s837_s13 = smov %s839_s17  ;;  %20 = sbr.rel (!%p18_p2) target bundleno = 8 (0x8), region = 90 }
  0x80   :  { %260 = vsyncpa [#allocation3], 1 }
  0x81   :  { %262 = vsyncpa [#allocation3 + $0x1], 1 }
  0x82   :  { %263 = vsyncpa [#allocation6], 1 }
  0x83   :  { %265 = vsyncpa [#allocation6 + $0x1], 1 }
  0x84   :  { %266 = vsyncpa [#allocation4], 1 }
  0x85   :  { %268 = vsyncpa [#allocation4 + $0x1], 1 }

</bundles_post_ra>
